<compile_context>
chip_gen: v6e
topology: v6e:2x2x1
jax: 0.10.0
libtpu: 0.0.40
codegen_flags: <defaults>
</compile_context>

<pallas_src>
import jax
import jax.numpy as jnp
from jax.experimental import pallas as pl
from jax.experimental.pallas import tpu as pltpu


def _make_kernel(snap_weights, compute_dtype):
    """snap_weights[j] = (#ks equal to j+1) / len(ks); nonzero entries trigger a
    prediction snapshot after extracting the (j+1)-th largest value."""
    max_k = len(snap_weights)

    def he2rna_kernel(x_ref, w0_ref, b0_ref, w1_ref, b1_ref, o_ref):
        x = x_ref[0]                                            # (L, Cp), compute dtype

        # tile mask: tile is valid iff max feature value > 0 (zero padding of
        # channels cannot flip this).  Shape (L, 1), f32.
        mask_col = (jnp.max(x.astype(jnp.float32), axis=1, keepdims=True) > 0.0
                    ).astype(jnp.float32)

        # conv0 (1x1) + ReLU  (dropout == identity in eval mode)
        h = jnp.dot(x, w0_ref[...], preferred_element_type=jnp.float32)
        h = jnp.maximum(h + b0_ref[...], 0.0)                   # (L, Hp) f32

        # conv1 (1x1), then zero out masked tiles
        y = jnp.dot(h.astype(compute_dtype), w1_ref[...],
                    preferred_element_type=jnp.float32)
        y = (y + b1_ref[...]) * mask_col                        # (L, TG) f32

        L, TG = y.shape
        sub = jax.lax.broadcasted_iota(jnp.int32, (L, TG), 0)   # sublane index

        # Iterative top-k along the sublane (tile) axis with fused prefix
        # accumulation.  All per-gene intermediates are lane-dense (1, TG).
        # TODO(synk): for very large max_k, move to lax.fori_loop(unroll=True)
        #   with a small carry, and fuse max+argmax into one packed-key pass.
        cur = y
        num = jnp.zeros((1, TG), jnp.float32)
        den = jnp.zeros((1, 1), jnp.float32)
        pred = jnp.zeros((1, TG), jnp.float32)
        for j in range(max_k):
            m = jnp.max(cur, axis=0, keepdims=True)             # (1, TG)
            # remove exactly the first occurrence of the max in each column
            idx = jnp.min(jnp.where(cur == m, sub, L), axis=0, keepdims=True)
            cur = jnp.where(sub == idx, -jnp.inf, cur)
            mval = mask_col[j:j + 1, :]                         # (1, 1) static slice
            num = num + m * mval
            den = den + mval
            w = snap_weights[j]
            if w != 0.0:                                        # static snapshot point
                pred = pred + num * (w / den)

        o_ref[0] = pred                                         # (1, TG) lane-dense store

    return he2rna_kernel


def _pad_to(n, m):
    return ((n + m - 1) // m) * m


def he2rna_forward(x, w0, b0, w1, b1, ks,
                   compute_dtype=jnp.float32, gene_tile=128):
    """x: (B, C_in, L) float32 (PyTorch NCL).  Returns (B, G) float32, eval mode.

    compute_dtype controls the matmul-input dtype (bfloat16 recommended on
    v6e/v7x); accumulation and all elementwise math stay in float32.
    """
    B, C_in, L = x.shape
    H = w0.shape[0]
    G = w1.shape[0]
    ks = tuple(int(k) for k in ks)
    n_ks = len(ks)
    max_k = max(ks)
    snap_weights = tuple(sum(1 for k in ks if k == j + 1) / n_ks
                         for j in range(max_k))

    Cp = _pad_to(C_in, 128)               # lane dim of x block / contraction dim
    Hp = _pad_to(H, 128)
    TG = min(gene_tile, _pad_to(G, 128))  # gene tile (lane dim of output)
    Gp = _pad_to(G, TG)

    # --- wrapper-side layout plumbing (transpose + zero pad), no compute ---
    x_t = jnp.transpose(x, (0, 2, 1))                                   # (B, L, C_in)
    x_t = jnp.pad(x_t, ((0, 0), (0, 0), (0, Cp - C_in))).astype(compute_dtype)
    w0_t = jnp.pad(w0.T, ((0, Cp - C_in), (0, Hp - H))).astype(compute_dtype)
    b0_p = jnp.pad(b0, (0, Hp - H)).reshape(1, Hp).astype(jnp.float32)
    w1_t = jnp.pad(w1.T, ((0, Hp - H), (0, Gp - G))).astype(compute_dtype)
    b1_p = jnp.pad(b1, (0, Gp - G)).reshape(1, Gp).astype(jnp.float32)

    kernel = _make_kernel(snap_weights, compute_dtype)

    out = pl.pallas_call(
        kernel,
        out_shape=jax.ShapeDtypeStruct((B, 1, Gp), jnp.float32),
        grid_spec=pltpu.PrefetchScalarGridSpec(
            num_scalar_prefetch=0,
            grid=(B, Gp // TG),
            in_specs=[
                pl.BlockSpec((1, L, Cp), lambda b, g: (b, 0, 0)),
                pl.BlockSpec((Cp, Hp), lambda b, g: (0, 0)),
                pl.BlockSpec((1, Hp), lambda b, g: (0, 0)),
                pl.BlockSpec((Hp, TG), lambda b, g: (0, g)),
                pl.BlockSpec((1, TG), lambda b, g: (0, g)),
            ],
            out_specs=pl.BlockSpec((1, 1, TG), lambda b, g: (b, 0, g)),
        ),
        compiler_params=pltpu.CompilerParams(
            dimension_semantics=("parallel", "parallel"),
            vmem_limit_bytes=32 * 1024 * 1024,   # explicit budget, v7x-safe
        ),
    )(x_t, w0_t, b0_p, w1_t, b1_p)

    return out[:, 0, :G]


def he2rna_ref(x, w0, b0, w1, b1, ks, compute_dtype=jnp.float32):
    """Pure-JAX reference matching the PyTorch eval-mode forward (with the same
    optional matmul-input cast as the kernel)."""
    mask = (jnp.max(x, axis=1, keepdims=True) > 0).astype(jnp.float32)      # (B,1,L)
    h = jax.nn.relu(
        jnp.einsum('hc,bcl->bhl', w0.astype(compute_dtype), x.astype(compute_dtype),
                   preferred_element_type=jnp.float32) + b0[None, :, None])
    y = jnp.einsum('gh,bhl->bgl', w1.astype(compute_dtype), h.astype(compute_dtype),
                   preferred_element_type=jnp.float32) + b1[None, :, None]
    y = y * mask
    pred = 0.0
    for k in ks:
        t = jax.lax.top_k(y, int(k))[0]                                     # (B,G,k)
        num = jnp.sum(t * mask[:, :, :k], axis=2)
        den = jnp.sum(mask[:, :, :k], axis=2)
        pred = pred + (num / den) / len(ks)
    return pred


if __name__ == "__main__":
    # Small shapes consistent with HE2RNA(input_dim=32, output_dim=4, layers=[8], ks=[3, 5])
    B, C_IN, L = 2, 32, 16     # batch, input_dim (feature channels), n_tiles
    H, G = 8, 4                # hidden layer dim, output_dim (genes)
    KS = (3, 5)                # top-k tile counts (eval averages over them)

    key = jax.random.PRNGKey(0)
    kx, kw0, kb0, kw1, kb1 = jax.random.split(key, 5)

    x = jax.random.normal(kx, (B, C_IN, L), dtype=jnp.float32)
    # make the last two tiles fully non-positive so their mask entries are 0
    x = x.at[:, :, -2:].set(-jnp.abs(x[:, :, -2:]) - 0.1)

    w0 = jax.random.normal(kw0, (H, C_IN), dtype=jnp.float32) * 0.1
    b0 = jax.random.normal(kb0, (H,), dtype=jnp.float32) * 0.1
    w1 = jax.random.normal(kw1, (G, H), dtype=jnp.float32) * 0.1
    b1 = jax.random.normal(kb1, (G,), dtype=jnp.float32) * 0.1

    # Exact f32 path (validates semantics against the PyTorch-equivalent reference).
    out_f32 = jax.block_until_ready(
        he2rna_forward(x, w0, b0, w1, b1, KS, compute_dtype=jnp.float32))
    ref_f32 = he2rna_ref(x, w0, b0, w1, b1, KS, compute_dtype=jnp.float32)
    assert out_f32.shape == (B, G)
    assert jnp.allclose(out_f32, ref_f32, atol=1e-4, rtol=1e-4), (out_f32, ref_f32)

    # bf16 MXU-input path (v6e/v7x recommendation); reference applies the same casts.
    out_bf16 = jax.block_until_ready(
        he2rna_forward(x, w0, b0, w1, b1, KS, compute_dtype=jnp.bfloat16))
    ref_bf16 = he2rna_ref(x, w0, b0, w1, b1, KS, compute_dtype=jnp.bfloat16)
    assert jnp.allclose(out_bf16, ref_bf16, atol=2e-3, rtol=2e-3), (out_bf16, ref_bf16)

    print("KERNEL_OK")
</pallas_src>

<mosaic_0001>
module attributes {stable_mosaic.version = 11 : i64} {
  func.func @he2rna_kernel(%arg0: i32, %arg1: i32, %arg2: memref<1x16x128xf32, #tpu.memory_space<vmem>>, %arg3: memref<128x128xf32, #tpu.memory_space<vmem>>, %arg4: memref<1x128xf32, #tpu.memory_space<vmem>>, %arg5: memref<128x128xf32, #tpu.memory_space<vmem>>, %arg6: memref<1x128xf32, #tpu.memory_space<vmem>>, %arg7: memref<1x1x128xf32, #tpu.memory_space<vmem>>) attributes {dimension_semantics = [#tpu.dimension_semantics<parallel>, #tpu.dimension_semantics<parallel>], iteration_bounds = array<i64: 2, 1>, scalar_prefetch = 0 : i64, scratch_operands = 0 : i64, tpu.core_type = #tpu.core_type<tc>, window_params = [{transform_indices = @transform_0, window_bounds = array<i64: 1, 16, 128>}, {pipeline_mode = #tpu.pipeline_mode<synchronous>, transform_indices = @transform_1, window_bounds = array<i64: 128, 128>}, {pipeline_mode = #tpu.pipeline_mode<synchronous>, transform_indices = @transform_2, window_bounds = array<i64: 1, 128>}, {transform_indices = @transform_3, window_bounds = array<i64: 128, 128>}, {transform_indices = @transform_4, window_bounds = array<i64: 1, 128>}, {transform_indices = @transform_5, window_bounds = array<i64: 1, 1, 128>}]} {
    %c0 = arith.constant 0 : index
    %c0_0 = arith.constant 0 : index
    %c0_1 = arith.constant 0 : index
    %0 = vector.load %arg2[%c0, %c0_0, %c0_1] : memref<1x16x128xf32, #tpu.memory_space<vmem>>, vector<1x16x128xf32>
    %1 = vector.shape_cast %0 : vector<1x16x128xf32> to vector<16x128xf32>
    %cst = arith.constant dense<0xFF800000> : vector<16xf32>
    %2 = vector.multi_reduction <maximumf>, %1, %cst [1] : vector<16x128xf32> to vector<16xf32>
    %3 = vector.shape_cast %2 : vector<16xf32> to vector<16x1xf32>
    %cst_2 = arith.constant 0.000000e+00 : f32
    %4 = vector.broadcast %cst_2 : f32 to vector<16x1xf32>
    %5 = arith.cmpf ogt, %3, %4 : vector<16x1xf32>
    %6 = arith.extui %5 : vector<16x1xi1> to vector<16x1xi32>
    %7 = arith.sitofp %6 : vector<16x1xi32> to vector<16x1xf32>
    %c0_3 = arith.constant 0 : index
    %c0_4 = arith.constant 0 : index
    %8 = vector.load %arg3[%c0_3, %c0_4] : memref<128x128xf32, #tpu.memory_space<vmem>>, vector<128x128xf32>
    %cst_5 = arith.constant dense<0.000000e+00> : vector<16x128xf32>
    %9 = tpu.matmul %1, %8, %cst_5 {dimension_numbers = #tpu.dot_dimension_numbers<[1], [0], [0], [1], [0, 0, 1, 1], [], []>} : vector<16x128xf32>, vector<128x128xf32>, vector<16x128xf32> -> vector<16x128xf32>
    %c0_6 = arith.constant 0 : index
    %c0_7 = arith.constant 0 : index
    %10 = vector.load %arg4[%c0_6, %c0_7] : memref<1x128xf32, #tpu.memory_space<vmem>>, vector<1x128xf32>
    %11 = vector.broadcast %10 : vector<1x128xf32> to vector<16x128xf32>
    %12 = arith.addf %9, %11 : vector<16x128xf32>
    %cst_8 = arith.constant 0.000000e+00 : f32
    %13 = vector.broadcast %cst_8 : f32 to vector<16x128xf32>
    %14 = arith.maximumf %12, %13 : vector<16x128xf32>
    %c0_9 = arith.constant 0 : index
    %c0_10 = arith.constant 0 : index
    %15 = vector.load %arg5[%c0_9, %c0_10] : memref<128x128xf32, #tpu.memory_space<vmem>>, vector<128x128xf32>
    %cst_11 = arith.constant dense<0.000000e+00> : vector<16x128xf32>
    %16 = tpu.matmul %14, %15, %cst_11 {dimension_numbers = #tpu.dot_dimension_numbers<[1], [0], [0], [1], [0, 0, 1, 1], [], []>} : vector<16x128xf32>, vector<128x128xf32>, vector<16x128xf32> -> vector<16x128xf32>
    %c0_12 = arith.constant 0 : index
    %c0_13 = arith.constant 0 : index
    %17 = vector.load %arg6[%c0_12, %c0_13] : memref<1x128xf32, #tpu.memory_space<vmem>>, vector<1x128xf32>
    %18 = vector.broadcast %17 : vector<1x128xf32> to vector<16x128xf32>
    %19 = arith.addf %16, %18 : vector<16x128xf32>
    %20 = vector.broadcast %7 : vector<16x1xf32> to vector<16x128xf32>
    %21 = arith.mulf %19, %20 : vector<16x128xf32>
    %22 = tpu.iota {dimensions = array<i32: 0>} : vector<16x128xi32>
    %cst_14 = arith.constant 0.000000e+00 : f32
    %23 = vector.broadcast %cst_14 : f32 to vector<1x128xf32>
    %cst_15 = arith.constant 0.000000e+00 : f32
    %24 = vector.broadcast %cst_15 : f32 to vector<1x1xf32>
    %cst_16 = arith.constant 0.000000e+00 : f32
    %25 = vector.broadcast %cst_16 : f32 to vector<1x128xf32>
    %cst_17 = arith.constant dense<0xFF800000> : vector<128xf32>
    %26 = vector.multi_reduction <maximumf>, %21, %cst_17 [0] : vector<16x128xf32> to vector<128xf32>
    %27 = vector.shape_cast %26 : vector<128xf32> to vector<1x128xf32>
    %28 = vector.broadcast %27 : vector<1x128xf32> to vector<16x128xf32>
    %29 = arith.cmpf oeq, %21, %28 : vector<16x128xf32>
    %c16_i32 = arith.constant 16 : i32
    %30 = vector.broadcast %c16_i32 : i32 to vector<16x128xi32>
    %31 = arith.select %29, %22, %30 : vector<16x128xi1>, vector<16x128xi32>
    %cst_18 = arith.constant dense<2147483647> : vector<128xi32>
    %32 = vector.multi_reduction <minsi>, %31, %cst_18 [0] : vector<16x128xi32> to vector<128xi32>
    %33 = vector.shape_cast %32 : vector<128xi32> to vector<1x128xi32>
    %34 = vector.broadcast %33 : vector<1x128xi32> to vector<16x128xi32>
    %35 = arith.cmpi eq, %22, %34 : vector<16x128xi32>
    %cst_19 = arith.constant 0xFF800000 : f32
    %36 = vector.broadcast %cst_19 : f32 to vector<16x128xf32>
    %37 = arith.select %35, %36, %21 : vector<16x128xi1>, vector<16x128xf32>
    %38 = vector.extract_strided_slice %7 {offsets = [0, 0], sizes = [1, 1], strides = [1, 1]} : vector<16x1xf32> to vector<1x1xf32>
    %39 = vector.broadcast %38 : vector<1x1xf32> to vector<1x128xf32>
    %40 = arith.mulf %27, %39 : vector<1x128xf32>
    %41 = arith.addf %23, %40 : vector<1x128xf32>
    %42 = arith.addf %24, %38 : vector<1x1xf32>
    %cst_20 = arith.constant dense<0xFF800000> : vector<128xf32>
    %43 = vector.multi_reduction <maximumf>, %37, %cst_20 [0] : vector<16x128xf32> to vector<128xf32>
    %44 = vector.shape_cast %43 : vector<128xf32> to vector<1x128xf32>
    %45 = vector.broadcast %44 : vector<1x128xf32> to vector<16x128xf32>
    %46 = arith.cmpf oeq, %37, %45 : vector<16x128xf32>
    %c16_i32_21 = arith.constant 16 : i32
    %47 = vector.broadcast %c16_i32_21 : i32 to vector<16x128xi32>
    %48 = arith.select %46, %22, %47 : vector<16x128xi1>, vector<16x128xi32>
    %cst_22 = arith.constant dense<2147483647> : vector<128xi32>
    %49 = vector.multi_reduction <minsi>, %48, %cst_22 [0] : vector<16x128xi32> to vector<128xi32>
    %50 = vector.shape_cast %49 : vector<128xi32> to vector<1x128xi32>
    %51 = vector.broadcast %50 : vector<1x128xi32> to vector<16x128xi32>
    %52 = arith.cmpi eq, %22, %51 : vector<16x128xi32>
    %cst_23 = arith.constant 0xFF800000 : f32
    %53 = vector.broadcast %cst_23 : f32 to vector<16x128xf32>
    %54 = arith.select %52, %53, %37 : vector<16x128xi1>, vector<16x128xf32>
    %55 = vector.extract_strided_slice %7 {offsets = [1, 0], sizes = [1, 1], strides = [1, 1]} : vector<16x1xf32> to vector<1x1xf32>
    %56 = vector.broadcast %55 : vector<1x1xf32> to vector<1x128xf32>
    %57 = arith.mulf %44, %56 : vector<1x128xf32>
    %58 = arith.addf %41, %57 : vector<1x128xf32>
    %59 = arith.addf %42, %55 : vector<1x1xf32>
    %cst_24 = arith.constant dense<0xFF800000> : vector<128xf32>
    %60 = vector.multi_reduction <maximumf>, %54, %cst_24 [0] : vector<16x128xf32> to vector<128xf32>
    %61 = vector.shape_cast %60 : vector<128xf32> to vector<1x128xf32>
    %62 = vector.broadcast %61 : vector<1x128xf32> to vector<16x128xf32>
    %63 = arith.cmpf oeq, %54, %62 : vector<16x128xf32>
    %c16_i32_25 = arith.constant 16 : i32
    %64 = vector.broadcast %c16_i32_25 : i32 to vector<16x128xi32>
    %65 = arith.select %63, %22, %64 : vector<16x128xi1>, vector<16x128xi32>
    %cst_26 = arith.constant dense<2147483647> : vector<128xi32>
    %66 = vector.multi_reduction <minsi>, %65, %cst_26 [0] : vector<16x128xi32> to vector<128xi32>
    %67 = vector.shape_cast %66 : vector<128xi32> to vector<1x128xi32>
    %68 = vector.broadcast %67 : vector<1x128xi32> to vector<16x128xi32>
    %69 = arith.cmpi eq, %22, %68 : vector<16x128xi32>
    %cst_27 = arith.constant 0xFF800000 : f32
    %70 = vector.broadcast %cst_27 : f32 to vector<16x128xf32>
    %71 = arith.select %69, %70, %54 : vector<16x128xi1>, vector<16x128xf32>
    %72 = vector.extract_strided_slice %7 {offsets = [2, 0], sizes = [1, 1], strides = [1, 1]} : vector<16x1xf32> to vector<1x1xf32>
    %73 = vector.broadcast %72 : vector<1x1xf32> to vector<1x128xf32>
    %74 = arith.mulf %61, %73 : vector<1x128xf32>
    %75 = arith.addf %58, %74 : vector<1x128xf32>
    %76 = arith.addf %59, %72 : vector<1x1xf32>
    %cst_28 = arith.constant 5.000000e-01 : f32
    %77 = vector.broadcast %cst_28 : f32 to vector<1x1xf32>
    %78 = arith.divf %77, %76 : vector<1x1xf32>
    %79 = vector.broadcast %78 : vector<1x1xf32> to vector<1x128xf32>
    %80 = arith.mulf %75, %79 : vector<1x128xf32>
    %81 = arith.addf %25, %80 : vector<1x128xf32>
    %cst_29 = arith.constant dense<0xFF800000> : vector<128xf32>
    %82 = vector.multi_reduction <maximumf>, %71, %cst_29 [0] : vector<16x128xf32> to vector<128xf32>
    %83 = vector.shape_cast %82 : vector<128xf32> to vector<1x128xf32>
    %84 = vector.broadcast %83 : vector<1x128xf32> to vector<16x128xf32>
    %85 = arith.cmpf oeq, %71, %84 : vector<16x128xf32>
    %c16_i32_30 = arith.constant 16 : i32
    %86 = vector.broadcast %c16_i32_30 : i32 to vector<16x128xi32>
    %87 = arith.select %85, %22, %86 : vector<16x128xi1>, vector<16x128xi32>
    %cst_31 = arith.constant dense<2147483647> : vector<128xi32>
    %88 = vector.multi_reduction <minsi>, %87, %cst_31 [0] : vector<16x128xi32> to vector<128xi32>
    %89 = vector.shape_cast %88 : vector<128xi32> to vector<1x128xi32>
    %90 = vector.broadcast %89 : vector<1x128xi32> to vector<16x128xi32>
    %91 = arith.cmpi eq, %22, %90 : vector<16x128xi32>
    %cst_32 = arith.constant 0xFF800000 : f32
    %92 = vector.broadcast %cst_32 : f32 to vector<16x128xf32>
    %93 = arith.select %91, %92, %71 : vector<16x128xi1>, vector<16x128xf32>
    %94 = vector.extract_strided_slice %7 {offsets = [3, 0], sizes = [1, 1], strides = [1, 1]} : vector<16x1xf32> to vector<1x1xf32>
    %95 = vector.broadcast %94 : vector<1x1xf32> to vector<1x128xf32>
    %96 = arith.mulf %83, %95 : vector<1x128xf32>
    %97 = arith.addf %75, %96 : vector<1x128xf32>
    %98 = arith.addf %76, %94 : vector<1x1xf32>
    %cst_33 = arith.constant dense<0xFF800000> : vector<128xf32>
    %99 = vector.multi_reduction <maximumf>, %93, %cst_33 [0] : vector<16x128xf32> to vector<128xf32>
    %100 = vector.shape_cast %99 : vector<128xf32> to vector<1x128xf32>
    %101 = vector.extract_strided_slice %7 {offsets = [4, 0], sizes = [1, 1], strides = [1, 1]} : vector<16x1xf32> to vector<1x1xf32>
    %102 = vector.broadcast %101 : vector<1x1xf32> to vector<1x128xf32>
    %103 = arith.mulf %100, %102 : vector<1x128xf32>
    %104 = arith.addf %97, %103 : vector<1x128xf32>
    %105 = arith.addf %98, %101 : vector<1x1xf32>
    %cst_34 = arith.constant 5.000000e-01 : f32
    %106 = vector.broadcast %cst_34 : f32 to vector<1x1xf32>
    %107 = arith.divf %106, %105 : vector<1x1xf32>
    %108 = vector.broadcast %107 : vector<1x1xf32> to vector<1x128xf32>
    %109 = arith.mulf %104, %108 : vector<1x128xf32>
    %110 = arith.addf %81, %109 : vector<1x128xf32>
    %c0_35 = arith.constant 0 : index
    %c0_36 = arith.constant 0 : index
    %c0_37 = arith.constant 0 : index
    %111 = vector.load %arg7[%c0_35, %c0_36, %c0_37] : memref<1x1x128xf32, #tpu.memory_space<vmem>>, vector<1x1x128xf32>
    %112 = vector.shape_cast %111 : vector<1x1x128xf32> to vector<1x128xf32>
    %113 = vector.shape_cast %110 : vector<1x128xf32> to vector<1x1x128xf32>
    tpu.vector_store %arg7[%c0_35, %c0_36, %c0_37], %113 {strides = array<i32>} : memref<1x1x128xf32, #tpu.memory_space<vmem>>, vector<1x1x128xf32>,
    return
  }
  func.func @transform_0(%arg0: i32, %arg1: i32) -> (i32, i32, i32) {
    %c0_i32 = arith.constant 0 : i32
    %c0_i32_0 = arith.constant 0 : i32
    %c0_i32_1 = arith.constant 0 : i32
    return %arg0, %c0_i32, %c0_i32_0 : i32, i32, i32
  }
  func.func @transform_1(%arg0: i32, %arg1: i32) -> (i32, i32) {
    %c0_i32 = arith.constant 0 : i32
    %c0_i32_0 = arith.constant 0 : i32
    %c0_i32_1 = arith.constant 0 : i32
    return %c0_i32, %c0_i32_0 : i32, i32
  }
  func.func @transform_2(%arg0: i32, %arg1: i32) -> (i32, i32) {
    %c0_i32 = arith.constant 0 : i32
    %c0_i32_0 = arith.constant 0 : i32
    %c0_i32_1 = arith.constant 0 : i32
    return %c0_i32, %c0_i32_0 : i32, i32
  }
  func.func @transform_3(%arg0: i32, %arg1: i32) -> (i32, i32) {
    %c0_i32 = arith.constant 0 : i32
    %c0_i32_0 = arith.constant 0 : i32
    return %c0_i32, %arg1 : i32, i32
  }
  func.func @transform_4(%arg0: i32, %arg1: i32) -> (i32, i32) {
    %c0_i32 = arith.constant 0 : i32
    %c0_i32_0 = arith.constant 0 : i32
    return %c0_i32, %arg1 : i32, i32
  }
  func.func @transform_5(%arg0: i32, %arg1: i32) -> (i32, i32, i32) {
    %c0_i32 = arith.constant 0 : i32
    %c0_i32_0 = arith.constant 0 : i32
    return %arg0, %c0_i32, %arg1 : i32, i32, i32
  }
}

</mosaic_0001>

<bundles_post_ra>
// kernel: tpu_custom_call.1
= control target key start
LH: loop header
LB: loop body
LE: loop exit
PB: predicated region body
PF: predicated region fallthrough
CT: control target
= control target key end

     0   :  { %s1466_s0 = inlined_call_operand.hbm [shape: f32[2,16,128], index: 0, kind: input, shape index: {}]   ;;  %s1467_s1 = inlined_call_operand.hbm [shape: f32[128,128], index: 1, kind: input, shape index: {}]   ;;  %s1468_s2 = inlined_call_operand.vmem [shape: f32[1,128], index: 2, kind: input, shape index: {}]   ;;  %s1469_s3 = inlined_call_operand.hbm [shape: f32[128,128], index: 3, kind: input, shape index: {}]   ;;  %s1470_s4 = inlined_call_operand.vmem [shape: f32[1,128], index: 4, kind: input, shape index: {}]   ;;  %s1471_s5 = inlined_call_operand.hbm [shape: f32[2,1,128], index: 5, kind: output, shape index: {}]  }
   0x1   :  { %1474 = sst [smem:[#allocation12_spill]] %s1467_s1 }
   0x2   :  { %10 = vsyncpa [#allocation3], 0 }
   0x3   :  { %12 = vsyncpa [#allocation3 + $0x1], 0 }
   0x4   :  { %13 = vsyncpa [#allocation6], 0 }
   0x5   :  { %14 = vsyncpa [#allocation4], 0 }
   0x6   :  { %16 = vsyncpa [#allocation4 + $0x1], 0  ;;  %s1234_s18 = smov 0   ;;  %s1236_s19 = smov 0  }
   0x7   :  { %s1238_s20 = smov 0   ;;  %s1240_s21 = smov 0  }
   0x8   :  { %s1242_s22 = smov 0   ;;  %s1244_s23 = smov 0  }
   0x9 LB: > { %s809_s24 = sadd.s32 4294967295, %s1194_s23   ;;  %s810_s25 = sadd.s32 4294967294, %s1194_s23   ;;  %s1194_s23 = sphi %s1244_s23, %s22_s23   ;;  %s1190_s22 = sphi %s1242_s22, %s1492_s22   ;;  %s1186_s21 = sphi %s1240_s21, %s1491_s21   ;;  %s1182_s20 = sphi %s1238_s20, %s1490_s20   ;;  %s1178_s19 = sphi %s1236_s19, %s1489_s19   ;;  %s1174_s18 = sphi %s1234_s18, %s1488_s18  }
   0xa   : > { %p54_p0 = scmp.ne.s32.totalorder %s1178_s19, %s1174_s18  ;;  %p1268_p1 = scmp.eq.s32.totalorder %s809_s24, 0 }
   0xb   : > { %p1272_p2 = scmp.eq.s32.totalorder %s809_s24, 1  ;;  %p180_p3 = scmp.eq.s32.totalorder %s810_s25, 1 }
   0xc   : > { %p1278_p4 = por %p1268_p1, %p54_p0  ;;  %p811_p5 = scmp.ge.s32.totalorder %s1194_s23, 1 }
   0xd   : > { %p1283_p6 = por %p180_p3, %p54_p0  ;;  %p187_p7 = scmp.lt.s32.totalorder %s1194_s23, 3 }
   0xe   : > { %s1196_s6 = smov [#allocation5]   ;;  %s1197_s9 = smov [#allocation7]  }
   0xf   : > { %s1478_s29 = scalar_select %p1283_p6, 1, 0 }
  0x10   : > { %p1288_p8 = pnand %p811_p5, %p187_p7  ;;  %s199_s7 = sshll.u32 %s1196_s6, 4  ;;  %s200_s7 = int_to_ptr.vmem [resolvable:$true] %s199_s7 }
  0x11   : > { %s217_s10 = sshll.u32 %s1197_s9, 4  ;;  %s1041_s11 = scalar_lea.vmem %s200_s7, 2048  ;;  %s218_s10 = int_to_ptr.vmem [resolvable:$true] %s217_s10 }
  0x12   : > { %p949_p9 = pneg %p1288_p8  ;;  %p1042_p13 = scmp.ne.s32.totalorder %s200_s7, %s1041_s11 }
  0x13   : > { %p1049_p5 = scmp.lt.s32.totalorder %s200_s7, %s200_s7  ;;  %p1050_p7 = scmp.lt.s32.totalorder %s1041_s11, %s1041_s11 }
  0x14   : > { %p1297_p11 = pnand %p949_p9, %p1268_p1 }
  0x15   : > { %p1051_p10 = por %p1050_p7, %p1049_p5 }
  0x16   : > { %p1032_p12 = pneg %p1297_p11 }
  0x18   : > { %p1044_p0 = pnand %p1042_p13, %p1032_p12 }
  0x1a   : > { %p1045_p3 = pneg %p1044_p0 }
  0x1c   : > { %p1052_p9 = pnand %p1051_p10, %p1045_p3 }
  0x1e   : > { %1055 = shalt.err (!%p1052_p9)
}
  0x1f   : > { %s1472_s12 = smov 128   ;;  %s1473_s13 = smov 8  }
  0x20   : > { %s1481_s1 = sld [smem:[#allocation12_spill]]  ;;  %s1067_s16 = scalar_lea.vmem %s218_s10, 2048 }
  0x21   : > { %p1068_p13 = scmp.ne.s32.totalorder %s218_s10, %s1067_s16  ;;  %p1075_p10 = scmp.lt.s32.totalorder %s218_s10, %s218_s10 }
  0x22   : > { %p1076_p3 = scmp.lt.s32.totalorder %s1067_s16, %s1067_s16 }
  0x23   : > { %p1070_p0 = pnand %p1068_p13, %p1032_p12 }
  0x24   : > { %p1077_p7 = por %p1076_p3, %p1075_p10 }
  0x25   : > { %p1071_p5 = pneg %p1070_p0 }
  0x26   : > { %952 = dma.hbm_to_vmem [thread:$0]  (!%p1297_p11), %s1481_s1, 2048, %s200_s7, [#allocation6], %s1472_s12, %s1472_s12, %s1473_s13  }
  0x27   : > { %p1078_p9 = pnand %p1077_p7, %p1071_p5 }
  0x29   : > { %1081 = shalt.err (!%p1078_p9)
}
  0x2a   : > { %955 = dma.hbm_to_vmem [thread:$0]  (!%p1297_p11), %s1469_s3, 2048, %s218_s10, [#allocation6], %s1472_s12, %s1472_s12, %s1473_s13  }
  0x2b   : > { %s34_s25 = sadd.s32 1, %s1190_s22  ;;  %s41_s6 = sadd.s32 1, %s1182_s20 }
  0x2c   : > { %p36_p12 = scmp.ge.s32.totalorder %s34_s25, 2  ;;  %p48_p13 = scmp.ne.s32.totalorder %s1182_s20, %s1178_s19 }
  0x2d   : > { %p49_p0 = scmp.eq.s32.totalorder %s1194_s23, 0  ;;  %p966_p5 = scmp.lt.s32.totalorder %s1194_s23, 2 }
  0x2e   : > { %s1494_s25 = smov (%p36_p12, %s34_s25), 0  ;;  %p1335_p3 = por %p1272_p2, %p48_p13 }
  0x2f   : > { %p50_p10 = por %p49_p0, %p48_p13  ;;  %s38_s8 = ssub.s32 %s1190_s22, %s1494_s25 }
  0x30   : > { %s237_s9 = sand.u32 1, %s1182_s20   ;;  %p39_p7 = scmp.eq.s32.totalorder %s38_s8, 0 }
  0x31   : > { %s816_s10 = sshll.u32 %s237_s9, 4  ;;  %s830_s11 = sshll.u32 %s1190_s22, 8 }
  0x32   : > { %s1344_s14 = scalar_select %p39_p7, %s1182_s20, %s41_s6  }
  0x33   : > { %s247_s17 = scalar_lea.hbm %s1466_s0, %s830_s11  ;;  %s241_s24 = scalar_lea.vmem [#allocation2], %s816_s10 }
  0x34   : > { %s248_s12 = sshll.u32 %s241_s24, 4  ;;  %p1351_p11 = pnand %p966_p5, %p50_p10  ;;  %s249_s12 = int_to_ptr.vmem [resolvable:$true] %s248_s12 }
  0x35   : > { %s238_s13 = scalar_lea.sflag [#allocation3], %s237_s9  ;;  %s1095_s8 = scalar_lea.vmem %s249_s12, 256 }
  0x36   : > { %p1084_p2 = pneg %p1351_p11  ;;  %p1096_p9 = scmp.ne.s32.totalorder %s249_s12, %s1095_s8 }
  0x37   : > { %s1200_s6 = smov [#allocation2]  }
  0x38   : > { %p1098_p12 = pnand %p1096_p9, %p1084_p2  ;;  %s1100_s1 = sshll.u32 %s1200_s6, 4  ;;  %s1101_s1 = int_to_ptr.vmem [resolvable:$false] %s1100_s1 }
  0x39   : > { %s1102_s11 = scalar_lea.vmem %s1101_s1, 512  ;;  %p1103_p0 = scmp.lt.s32.totalorder %s249_s12, %s1101_s1 }
  0x3a   : > { %p1099_p13 = pneg %p1098_p12  ;;  %p1104_p7 = scmp.lt.s32.totalorder %s1102_s11, %s1095_s8 }
  0x3c   : > { %p1105_p6 = por %p1104_p7, %p1103_p0 }
  0x3e   : > { %p1106_p5 = pnand %p1105_p6, %p1099_p13 }
  0x40   : > { %1109 = shalt.err (!%p1106_p5)
}
  0x41   : > { %s1484_s10 = smov 8   ;;  %s1485_s15 = smov 128  }
  0x42   : > { %959 = dma.hbm_to_vmem [thread:$0]  (!%p1351_p11), %s247_s17, 256, %s249_s12, %s238_s13, %s1485_s15, %s1485_s15, %s1484_s10  }
  0x43   : > { %260 = sbr.rel (%p1288_p8) target bundleno = 672 (0x2a0), region = 40  ;;  %s1365_s9 = sand.u32 (!%p1288_p8), 1, %s1178_s19  }
  0x44   : > { %s820_s1 = sshll.u32 (!%p1288_p8), %s1365_s9, 4  ;;  %s263_s16 = scalar_lea.sflag (!%p1288_p8), [#allocation3], %s1365_s9 }
  0x45   : > { %s1369_s24 = scalar_lea.vmem (!%p1288_p8), [#allocation2], %s820_s1 }
  0x48   : > { %1161 = dma.done.wait (%p1278_p4), %s263_s16, 256  }
  0x49   : > { %1163 = vsyncadd (%p1278_p4), %s263_s16, 4294967040 }
  0x4a   : > { %1165 = dma.done.wait (%p1268_p1), [#allocation6], 4096  }
  0x4b   : > { %1167 = vsyncadd (%p1268_p1), [#allocation6], 4294963200  ;;  %v333_v0 = vld [vmem:[#allocation5 + $0x78] sm:$0xff]  ;;  %v332_v1 = vld [vmem:[#allocation5 + $0x70] sm:$0xff]  ;;  %v1201_v34 = vmov 0   ;;  %v1202_v36 = vmov 0.0  }
  0x4c   : > { %867 = vmatprep.subr.mxu0 %v333_v0  ;;  %v331_v2 = vld [vmem:[#allocation5 + $0x68] sm:$0xff]  ;;  %v330_v3 = vld [vmem:[#allocation5 + $0x60] sm:$0xff]  ;;  %v329_v5 = vld [vmem:[#allocation5 + $0x58] sm:$0xff]  ;;  %1024 = vset.pattern.permute.xlu1 %v1201_v34  ;;  %s827_s13 = sshll.u32 %s1186_s21, 4  ;;  %s302_s17 = scalar_lea.vmem [#allocation8], %s1365_s9 }
  0x4d   : > { %868 = vmatpush3.msra.mxu0 %v333_v0  ;;  %v1380_v4 = vld [vmem:[%s1369_s24] sm:$0xff]  ;;  %v433_v6 = vld [vmem:[#allocation7 + $0x78] sm:$0xff]  ;;  %v431_v9 = vld [vmem:[#allocation7 + $0x68] sm:$0xff]  ;;  %1025 = vset.pattern.permute.xlu0 %v1201_v34  ;;  %s701_s27 = sshll.u32 %s302_s17, 4  ;;  %s699_s11 = scalar_lea.hbm %s1471_s5, %s827_s13  ;;  %s702_s27 = int_to_ptr.vmem [resolvable:$true] %s701_s27 }
  0x4e   : > { %869 = vmatprep.subr.mxu0 %v332_v1  ;;  %899 = vmatprep.mubr.f32.mxu0 %v1380_v4  ;;  %v432_v7 = vld [vmem:[#allocation7 + $0x70] sm:$0xff]  ;;  %v327_v10 = vld [vmem:[#allocation5 + $0x48] sm:$0xff]  ;;  %v430_v11 = vld [vmem:[#allocation7 + $0x60] sm:$0xff]  ;;  %s688_s10 = scalar_lea.sflag [#allocation4], %s1365_s9  ;;  %s1110_s15 = scalar_lea.vmem %s702_s27, 16 }
  0x4f   : > { %870 = vmatpush3.msra.mxu0 %v332_v1  ;;  %902 = vmatprep.subr.mxu1 %v433_v6  ;;  %v328_v8 = vld [vmem:[#allocation5 + $0x50] sm:$0xff]  ;;  %v326_v12 = vld [vmem:[#allocation5 + $0x40] sm:$0xff]  ;;  %v429_v13 = vld [vmem:[#allocation7 + $0x58] sm:$0xff]  ;;  %p1111_p1 = scmp.ne.s32.totalorder %s702_s27, %s1110_s15  ;;  %s1203_s1 = smov [#allocation8]  }
  0x50   : > { %871 = vmatprep.subr.mxu0 %v331_v2  ;;  %903 = vmatpush3.msra.mxu1 %v433_v6  ;;  %v325_v14 = vld [vmem:[#allocation5 + $0x38] sm:$0xff]  ;;  %v428_v15 = vld [vmem:[#allocation7 + $0x50] sm:$0xff]  ;;  %v427_v17 = vld [vmem:[#allocation7 + $0x48] sm:$0xff]  ;;  %s1114_s16 = sshll.u32 %s1203_s1, 4  ;;  %s1115_s16 = int_to_ptr.vmem [resolvable:$false] %s1114_s16 }
  0x51   : > { %872 = vmatpush3.msra.mxu0 %v331_v2  ;;  %904 = vmatprep.subr.mxu1 %v432_v7  ;;  %v324_v16 = vld [vmem:[#allocation5 + $0x30] sm:$0xff]  ;;  %v323_v18 = vld [vmem:[#allocation5 + $0x28] sm:$0xff]  ;;  %v426_v19 = vld [vmem:[#allocation7 + $0x40] sm:$0xff]  ;;  %p1112_p4 = pnand %p1111_p1, %p1335_p3  ;;  %s1116_s21 = scalar_lea.vmem %s1115_s16, 32 }
  0x52   : > { %873 = vmatprep.subr.mxu0 %v330_v3  ;;  %905 = vmatpush3.msra.mxu1 %v432_v7  ;;  %v322_v20 = vld [vmem:[#allocation5 + $0x20] sm:$0xff]  ;;  %v425_v21 = vld [vmem:[#allocation7 + $0x38] sm:$0xff]  ;;  %v424_v23 = vld [vmem:[#allocation7 + $0x30] sm:$0xff]  ;;  %p1117_p8 = scmp.lt.s32.totalorder %s702_s27, %s1115_s16  ;;  %p1118_p10 = scmp.lt.s32.totalorder %s1116_s21, %s1110_s15 }
  0x53   : > { %874 = vmatpush3.msra.mxu0 %v330_v3  ;;  %906 = vmatprep.subr.mxu1 %v431_v9  ;;  %v321_v22 = vld [vmem:[#allocation5 + $0x18] sm:$0xff]  ;;  %v320_v24 = vld [vmem:[#allocation5 + $0x10] sm:$0xff]  ;;  %v423_v25 = vld [vmem:[#allocation7 + $0x28] sm:$0xff]  ;;  %p1113_p6 = pneg %p1112_p4 }
  0x54   : > { %875 = vmatprep.subr.mxu0 %v329_v5  ;;  %907 = vmatpush3.msra.mxu1 %v431_v9  ;;  %v319_v26 = vld [vmem:[#allocation5 + $0x8] sm:$0xff]  ;;  %v422_v27 = vld [vmem:[#allocation7 + $0x20] sm:$0xff]  ;;  %v421_v30 = vld [vmem:[#allocation7 + $0x18] sm:$0xff]  ;;  %p1119_p11 = por %p1118_p10, %p1117_p8 }
  0x55   : > { %876 = vmatpush3.msra.mxu0 %v329_v5  ;;  %908 = vmatprep.subr.mxu1 %v430_v11  ;;  %v318_v28 = vld [vmem:[#allocation5] sm:$0xff]  ;;  %v307_v29 = vld [vmem:[%s1369_s24 + $0x8] sm:$0xff]  ;;  %v420_v31 = vld [vmem:[#allocation7 + $0x10] sm:$0xff] }
  0x56   : > { %877 = vmatprep.subr.mxu0 %v328_v8  ;;  %909 = vmatpush3.msra.mxu1 %v430_v11  ;;  %v419_v32 = vld [vmem:[#allocation7 + $0x8] sm:$0xff]  ;;  %v418_v33 = vld [vmem:[#allocation7] sm:$0xff]  ;;  %p1120_p2 = pnand %p1119_p11, %p1113_p6 }
  0x57   : > { %878 = vmatpush3.msra.mxu0 %v328_v8  ;;  %910 = vmatprep.subr.mxu1 %v429_v13  ;;  %v825_v44 = vld [vmem:[%s1468_s2] ss:$0 sm:$0xff] }
  0x58   : > { %879 = vmatprep.subr.mxu0 %v327_v10  ;;  %911 = vmatpush3.msra.mxu1 %v429_v13  ;;  %v826_v58 = vld [vmem:[%s1470_s4] ss:$0 sm:$0xff] }
  0x59   : > { %880 = vmatpush3.msra.mxu0 %v327_v10  ;;  %912 = vmatprep.subr.mxu1 %v428_v15 }
  0x5a   : > { %881 = vmatprep.subr.mxu0 %v326_v12  ;;  %913 = vmatpush3.msra.mxu1 %v428_v15 }
  0x5b   : > { %882 = vmatpush3.msra.mxu0 %v326_v12  ;;  %914 = vmatprep.subr.mxu1 %v427_v17 }
  0x5c   : > { %883 = vmatprep.subr.mxu0 %v325_v14  ;;  %915 = vmatpush3.msra.mxu1 %v427_v17 }
  0x5d   : > { %884 = vmatpush3.msra.mxu0 %v325_v14  ;;  %916 = vmatprep.subr.mxu1 %v426_v19 }
  0x5e   : > { %885 = vmatprep.subr.mxu0 %v324_v16  ;;  %917 = vmatpush3.msra.mxu1 %v426_v19 }
  0x5f   : > { %886 = vmatpush3.msra.mxu0 %v324_v16  ;;  %918 = vmatprep.subr.mxu1 %v425_v21 }
  0x60   : > { %887 = vmatprep.subr.mxu0 %v323_v18  ;;  %919 = vmatpush3.msra.mxu1 %v425_v21 }
  0x61   : > { %888 = vmatpush3.msra.mxu0 %v323_v18  ;;  %920 = vmatprep.subr.mxu1 %v424_v23 }
  0x62   : > { %889 = vmatprep.subr.mxu0 %v322_v20  ;;  %921 = vmatpush3.msra.mxu1 %v424_v23 }
  0x63   : > { %890 = vmatpush3.msra.mxu0 %v322_v20  ;;  %922 = vmatprep.subr.mxu1 %v423_v25 }
  0x64   : > { %891 = vmatprep.subr.mxu0 %v321_v22  ;;  %923 = vmatpush3.msra.mxu1 %v423_v25 }
  0x65   : > { %892 = vmatpush3.msra.mxu0 %v321_v22  ;;  %924 = vmatprep.subr.mxu1 %v422_v27 }
  0x66   : > { %893 = vmatprep.subr.mxu0 %v320_v24  ;;  %925 = vmatpush3.msra.mxu1 %v422_v27 }
  0x67   : > { %894 = vmatpush3.msra.mxu0 %v320_v24  ;;  %308 = vmax.xlane.f32.xlu0 %v1380_v4  ;;  %v518_v4 = vlaneseq }
  0x68   : > { %895 = vmatprep.subr.mxu0 %v319_v26  ;;  %926 = vmatprep.subr.mxu1 %v421_v30 }
  0x69   : > { %896 = vmatpush3.msra.mxu0 %v319_v26  ;;  %927 = vmatpush3.msra.mxu1 %v421_v30  ;;  %v1399_v7 = vshrl.u32 %v518_v4, 7 }
  0x6a   : > { %897 = vmatprep.subr.mxu0 %v318_v28  ;;  %928 = vmatprep.subr.mxu1 %v420_v31 }
  0x6b   : > { %898 = vmatpush3.msra.mxu0 %v318_v28  ;;  %310 = vmax.xlane.f32.xlu0 %v307_v29  ;;  %v1402_v10 = vadd.s32 8, %v1399_v7 }
  0x6c   : > { %900 = vmatmul.mubr.f32.vlgmr.msra.gmra.mxu0 %v307_v29  ;;  %929 = vmatpush3.msra.mxu1 %v420_v31 }
  0x6d   : > { %930 = vmatprep.subr.mxu1 %v419_v32 }
  0x6e   : > { %931 = vmatpush3.msra.mxu1 %v419_v32 }
  0x6f   : > { %932 = vmatprep.subr.mxu1 %v418_v33 }
  0x70   : > { %933 = vmatpush3.msra.mxu1 %v418_v33 }
  0xf0   : > { %v309_v35 = vpop.xlane.xlu0 %308 }
  0xf1   : > { %vm312_vm0 = vcmp.gt.f32.partialorder %v309_v35, 0.0 }
  0xf2   : > { %v1385_v37 = vsel %vm312_vm0, 1.0, %v1202_v36 }
  0xf3   : > { %v582_v38 = vrot.slane %v1385_v37, 1  ;;  %v616_v39 = vrot.slane %v1385_v37, 2  ;;  %v659_v51 = vrot.slane %v1385_v37, 3  ;;  %v674_v53 = vrot.slane %v1385_v37, 4 }
  0xf4   : > { %v311_v57 = vpop.xlane.xlu0 %310 }
  0xf5   : > { %v584_v40 = vadd.f32 %v1385_v37, %v582_v38  ;;  %vm313_vm1 = vcmp.gt.f32.partialorder %v311_v57, 0.0 }
  0xf6   : > { %v824_v61 = vsel %vm313_vm1, 1.0, %v1202_v36 }
  0xf7   : > { %v618_v41 = vadd.f32 %v616_v39, %v584_v40 }
  0xf9   : > { %1026 = vrcp.f32 %v618_v41  ;;  %v661_v52 = vadd.f32 %v659_v51, %v618_v41 }
  0xfb   : > { %v676_v54 = vadd.f32 %v674_v53, %v661_v52 }
  0xfd   : > { %1028 = vrcp.f32 %v676_v54 }
 0x106   : > { %v1027_v42 = vpop.eup %1026 }
 0x107   : > { %v620_v43 = vmul.f32 0.5, %v1027_v42 }
 0x109   : > { %623 = vperm.xlu1 %1024, %v620_v43  }
 0x10a   : > { %v1029_v55 = vpop.eup %1028 }
 0x10b   : > { %v678_v56 = vmul.f32 0.5, %v1029_v55 }
 0x10d   : > { %681 = vperm.xlu1 %1024, %v678_v56  }
 0x12c   : > { %v901_v45 = vpop.f32.mrf.mxu0 }
 0x12d   : > { %v413_v46 = vadd.f32 %v901_v45, %v825_v44 }
 0x12e   : > { %v407_v47 = vpop.f32.mrf.mxu0 }
 0x12f   : > { %v408_v48 = vadd.f32 %v825_v44, %v407_v47  ;;  %v417_v50 = vmax.f32 %v413_v46, 0.0 }
 0x131   : > { %v416_v49 = vmax.f32 %v408_v48, 0.0 }
 0x133   : > { %934 = vmatprep.mubr.f32.mxu1 %v416_v49 }
 0x134   : > { %935 = vmatmul.mubr.f32.vlgmr.msra.gmra.mxu1 %v417_v50 }
 0x1f4   : > { %v936_v59 = vpop.f32.mrf.mxu1 }
 0x1f5   : > { %v513_v60 = vadd.f32 %v936_v59, %v826_v58 }
 0x1f6   : > { %v507_v62 = vpop.f32.mrf.mxu1 }
 0x1f7   : > { %v508_v63 = vadd.f32 %v826_v58, %v507_v62  ;;  %v517_v0 = vmul.f32 %v824_v61, %v513_v60 }
 0x1f9   : > { %v516_v1 = vmul.f32 %v1385_v37, %v508_v63 }
 0x1fb   : > { %v521_v2 = vmax.f32 %v516_v1, %v517_v0 }
 0x1fd   : > { %v522_v3 = vrot.slane %v521_v2, 4 }
 0x1ff   : > { %v523_v5 = vmax.f32 %v521_v2, %v522_v3 }
 0x201   : > { %v524_v6 = vrot.slane %v523_v5, 2 }
 0x203   : > { %v525_v8 = vmax.f32 %v523_v5, %v524_v6 }
 0x205   : > { %v526_v9 = vrot.slane %v525_v8, 1 }
 0x207   : > { %v527_v11 = vmax.f32 %v525_v8, %v526_v9 }
 0x209   : > { %vm528_vm2 = vcmp.eq.f32.partialorder %v516_v1, %v527_v11  ;;  %vm529_vm3 = vcmp.eq.f32.partialorder %v517_v0, %v527_v11  ;;  %v547_v33 = vmul.f32 %v1385_v37, %v527_v11 }
 0x20a   : > { %v530_v12 = vsel %vm528_vm2, %v1399_v7, 16  ;;  %v531_v13 = vsel %vm529_vm3, %v1402_v10, 16 }
 0x20b   : > { %vm532_vm4 = vcmp.lt.s32.totalorder %v530_v12, %v531_v13 }
 0x20c   : > { %v533_v14 = vsel %vm532_vm4, %v530_v12, %v531_v13 }
 0x20d   : > { %v534_v15 = vrot.slane %v533_v14, 4 }
 0x20f   : > { %vm535_vm5 = vcmp.lt.s32.totalorder %v533_v14, %v534_v15 }
 0x210   : > { %v536_v16 = vsel %vm535_vm5, %v533_v14, %v534_v15 }
 0x211   : > { %v537_v17 = vrot.slane %v536_v16, 2 }
 0x213   : > { %vm538_vm6 = vcmp.lt.s32.totalorder %v536_v16, %v537_v17 }
 0x214   : > { %v539_v18 = vsel %vm538_vm6, %v536_v16, %v537_v17 }
 0x215   : > { %v540_v19 = vrot.slane %v539_v18, 1 }
 0x217   : > { %vm541_vm7 = vcmp.lt.s32.totalorder %v539_v18, %v540_v19 }
 0x218   : > { %v542_v20 = vsel %vm541_vm7, %v539_v18, %v540_v19 }
 0x219   : > { %vm543_vm8 = vcmp.eq.s32.totalorder %v1399_v7, %v542_v20  ;;  %vm544_vm9 = vcmp.eq.s32.totalorder %v1402_v10, %v542_v20 }
 0x21a   : > { %v545_v21 = vsel %vm543_vm8, -inf, %v516_v1  ;;  %v546_v22 = vsel %vm544_vm9, -inf, %v517_v0 }
 0x21b   : > { %v550_v23 = vmax.f32 %v545_v21, %v546_v22 }
 0x21d   : > { %v551_v24 = vrot.slane %v550_v23, 4 }
 0x21f   : > { %v552_v25 = vmax.f32 %v550_v23, %v551_v24 }
 0x221   : > { %v553_v26 = vrot.slane %v552_v25, 2 }
 0x223   : > { %v554_v27 = vmax.f32 %v552_v25, %v553_v26 }
 0x225   : > { %v555_v28 = vrot.slane %v554_v27, 1 }
 0x227   : > { %v556_v29 = vmax.f32 %v554_v27, %v555_v28 }
 0x229   : > { %vm557_vm10 = vcmp.eq.f32.partialorder %v545_v21, %v556_v29  ;;  %vm558_vm11 = vcmp.eq.f32.partialorder %v546_v22, %v556_v29  ;;  %v576_v30 = vmul.f32 %v1385_v37, %v556_v29 }
 0x22a   : > { %v559_v31 = vsel %vm557_vm10, %v1399_v7, 16  ;;  %v560_v32 = vsel %vm558_vm11, %v1402_v10, 16 }
 0x22b   : > { %vm561_vm12 = vcmp.lt.s32.totalorder %v559_v31, %v560_v32  ;;  %v578_v34 = vrot.slane %v576_v30, 1 }
 0x22c   : > { %v562_v35 = vsel %vm561_vm12, %v559_v31, %v560_v32 }
 0x22d   : > { %v563_v36 = vrot.slane %v562_v35, 4  ;;  %v580_v38 = vadd.f32 %v578_v34, %v547_v33  ;;  %v624_v34 = vpop.permute.xlu1 %623 }
 0x22f   : > { %vm564_vm13 = vcmp.lt.s32.totalorder %v562_v35, %v563_v36 }
 0x230   : > { %v565_v39 = vsel %vm564_vm13, %v562_v35, %v563_v36 }
 0x231   : > { %v566_v40 = vrot.slane %v565_v39, 2  ;;  %v682_v36 = vpop.permute.xlu1 %681 }
 0x233   : > { %vm567_vm14 = vcmp.lt.s32.totalorder %v565_v39, %v566_v40 }
 0x234   : > { %v568_v41 = vsel %vm567_vm14, %v565_v39, %v566_v40 }
 0x235   : > { %v569_v42 = vrot.slane %v568_v41, 1 }
 0x237   : > { %vm570_vm15 = vcmp.lt.s32.totalorder %v568_v41, %v569_v42 }
 0x238   : > { %v571_v43 = vsel %vm570_vm15, %v568_v41, %v569_v42 }
 0x239   : > { %vm572_vm0 = vcmp.eq.s32.totalorder %v1399_v7, %v571_v43  ;;  %vm573_vm1 = vcmp.eq.s32.totalorder %v1402_v10, %v571_v43 }
 0x23a   : > { %v574_v44 = vsel %vm572_vm0, -inf, %v545_v21  ;;  %v575_v45 = vsel %vm573_vm1, -inf, %v546_v22 }
 0x23b   : > { %v585_v46 = vmax.f32 %v574_v44, %v575_v45 }
 0x23d   : > { %v586_v47 = vrot.slane %v585_v46, 4 }
 0x23f   : > { %v587_v48 = vmax.f32 %v585_v46, %v586_v47 }
 0x241   : > { %v588_v49 = vrot.slane %v587_v48, 2 }
 0x243   : > { %v589_v50 = vmax.f32 %v587_v48, %v588_v49 }
 0x245   : > { %v590_v51 = vrot.slane %v589_v50, 1 }
 0x247   : > { %v591_v52 = vmax.f32 %v589_v50, %v590_v51 }
 0x249   : > { %vm592_vm2 = vcmp.eq.f32.partialorder %v574_v44, %v591_v52  ;;  %vm593_vm3 = vcmp.eq.f32.partialorder %v575_v45, %v591_v52  ;;  %v611_v53 = vmul.f32 %v1385_v37, %v591_v52 }
 0x24a   : > { %v594_v54 = vsel %vm592_vm2, %v1399_v7, 16  ;;  %v595_v55 = vsel %vm593_vm3, %v1402_v10, 16 }
 0x24b   : > { %vm596_vm4 = vcmp.lt.s32.totalorder %v594_v54, %v595_v55  ;;  %v613_v56 = vrot.slane %v611_v53, 2 }
 0x24c   : > { %v597_v57 = vsel %vm596_vm4, %v594_v54, %v595_v55 }
 0x24d   : > { %v598_v58 = vrot.slane %v597_v57, 4  ;;  %v615_v59 = vadd.f32 %v613_v56, %v580_v38 }
 0x24f   : > { %vm599_vm5 = vcmp.lt.s32.totalorder %v597_v57, %v598_v58 }
 0x250   : > { %v600_v60 = vsel %vm599_vm5, %v597_v57, %v598_v58 }
 0x251   : > { %v601_v61 = vrot.slane %v600_v60, 2 }
 0x253   : > { %vm602_vm6 = vcmp.lt.s32.totalorder %v600_v60, %v601_v61 }
 0x254   : > { %v603_v62 = vsel %vm602_vm6, %v600_v60, %v601_v61 }
 0x255   : > { %v604_v63 = vrot.slane %v603_v62, 1 }
 0x257   : > { %vm605_vm7 = vcmp.lt.s32.totalorder %v603_v62, %v604_v63 }
 0x258   : > { %v606_v0 = vsel %vm605_vm7, %v603_v62, %v604_v63 }
 0x259   : > { %vm607_vm8 = vcmp.eq.s32.totalorder %v1399_v7, %v606_v0  ;;  %vm608_vm9 = vcmp.eq.s32.totalorder %v1402_v10, %v606_v0 }
 0x25a   : > { %v609_v1 = vsel %vm607_vm8, -inf, %v574_v44  ;;  %v610_v2 = vsel %vm608_vm9, -inf, %v575_v45 }
 0x25b   : > { %v628_v3 = vmax.f32 %v609_v1, %v610_v2 }
 0x25d   : > { %v629_v4 = vrot.slane %v628_v3, 4 }
 0x25f   : > { %v630_v5 = vmax.f32 %v628_v3, %v629_v4 }
 0x261   : > { %v631_v6 = vrot.slane %v630_v5, 2 }
 0x263   : > { %v632_v8 = vmax.f32 %v630_v5, %v631_v6 }
 0x265   : > { %v633_v9 = vrot.slane %v632_v8, 1 }
 0x267   : > { %v634_v11 = vmax.f32 %v632_v8, %v633_v9 }
 0x269   : > { %vm635_vm10 = vcmp.eq.f32.partialorder %v609_v1, %v634_v11  ;;  %vm636_vm11 = vcmp.eq.f32.partialorder %v610_v2, %v634_v11  ;;  %v654_v12 = vmul.f32 %v1385_v37, %v634_v11 }
 0x26a   : > { %v637_v13 = vsel %vm635_vm10, %v1399_v7, 16  ;;  %v638_v14 = vsel %vm636_vm11, %v1402_v10, 16 }
 0x26b   : > { %vm639_vm12 = vcmp.lt.s32.totalorder %v637_v13, %v638_v14  ;;  %v656_v15 = vrot.slane %v654_v12, 3 }
 0x26c   : > { %v640_v16 = vsel %vm639_vm12, %v637_v13, %v638_v14 }
 0x26d   : > { %v641_v17 = vrot.slane %v640_v16, 4  ;;  %v658_v18 = vadd.f32 %v656_v15, %v615_v59 }
 0x26f   : > { %vm642_vm13 = vcmp.lt.s32.totalorder %v640_v16, %v641_v17 }
 0x270   : > { %v643_v19 = vsel %vm642_vm13, %v640_v16, %v641_v17 }
 0x271   : > { %v644_v20 = vrot.slane %v643_v19, 2 }
 0x273   : > { %vm645_vm14 = vcmp.lt.s32.totalorder %v643_v19, %v644_v20 }
 0x274   : > { %v646_v21 = vsel %vm645_vm14, %v643_v19, %v644_v20 }
 0x275   : > { %v647_v22 = vrot.slane %v646_v21, 1 }
 0x277   : > { %vm648_vm15 = vcmp.lt.s32.totalorder %v646_v21, %v647_v22 }
 0x278   : > { %v649_v23 = vsel %vm648_vm15, %v646_v21, %v647_v22 }
 0x279   : > { %vm650_vm0 = vcmp.eq.s32.totalorder %v1399_v7, %v649_v23  ;;  %vm651_vm1 = vcmp.eq.s32.totalorder %v1402_v10, %v649_v23  ;;  %v626_v10 = vmul.f32 %v624_v34, %v615_v59 }
 0x27a   : > { %v652_v24 = vsel %vm650_vm0, -inf, %v609_v1  ;;  %v653_v25 = vsel %vm651_vm1, -inf, %v610_v2 }
 0x27b   : > { %v662_v26 = vmax.f32 %v652_v24, %v653_v25 }
 0x27d   : > { %v663_v27 = vrot.slane %v662_v26, 4 }
 0x27f   : > { %v664_v28 = vmax.f32 %v662_v26, %v663_v27 }
 0x281   : > { %v665_v29 = vrot.slane %v664_v28, 2 }
 0x283   : > { %v666_v30 = vmax.f32 %v664_v28, %v665_v29 }
 0x285   : > { %v667_v31 = vrot.slane %v666_v30, 1 }
 0x287   : > { %v668_v32 = vmax.f32 %v666_v30, %v667_v31 }
 0x289   : > { %v669_v33 = vmul.f32 %v1385_v37, %v668_v32 }
 0x28b   : > { %v671_v35 = vrot.slane %v669_v33, 4 }
 0x28d   : > { %v673_v7 = vadd.f32 %v671_v35, %v658_v18 }
 0x28f   : > { %v684_v38 = vmul.f32 %v682_v36, %v673_v7 }
 0x291   : > { %v685_v39 = vadd.f32 %v684_v38, %v626_v10 }
 0x293   : > { %686 = vst [vmem:[%s302_s17] sm:$0x1] %v685_v39 }
 0x294   : > { %1123 = shalt.err (!%p1120_p2)
}
 0x295   : > { %s1124_s24 = scalar_lea.hbm %s699_s11, 16  ;;  %s1128_s28 = scalar_lea.hbm %s1471_s5, 32 }
 0x296   : > { %p1125_p9 = scmp.ne.s32.totalorder %s699_s11, %s1124_s24  ;;  %p1129_p0 = scmp.lt.s32.totalorder %s699_s11, %s1471_s5 }
 0x297   : > { %p1130_p7 = scmp.lt.s32.totalorder %s1128_s28, %s1124_s24 }
 0x298   : > { %p1126_p12 = pnand %p1125_p9, %p1335_p3 }
 0x299   : > { %p1131_p5 = por %p1130_p7, %p1129_p0 }
 0x29a   : > { %p1127_p13 = pneg %p1126_p12 }
 0x29c   : > { %p1132_p1 = pnand %p1131_p5, %p1127_p13 }
 0x29e   : > { %1135 = shalt.err (!%p1132_p1)
}
 0x29f   : > { %947 = dma.vmem_to_hbm [thread:$0]  (%p1335_p3), %s702_s27, 16, %s699_s11, %s688_s10  }
 0x2a0 PF: > { %s713_s13 = sand.u32 1, %s1174_s18   ;;  %p1486_p4 = scmp.ne.s32.totalorder %s1478_s29, 0 }
 0x2a1   : > { %p1487_p6 = scmp.ge.s32.totalorder %s1194_s23, 2  ;;  %s714_s17 = scalar_lea.sflag [#allocation4], %s713_s13 }
 0x2a3   : > { %p961_p8 = pnand %p1487_p6, %p1486_p4 }
 0x2a5   : > { %p962_p10 = pneg %p961_p8 }
 0x2a7   : > { %1169 = dma.done.wait (%p962_p10), %s714_s17, 16  }
 0x2a8   : > { %1171 = vsyncadd (%p962_p10), %s714_s17, 4294967280  ;;  %s22_s23 = sadd.s32 1, %s1194_s23   ;;  %s1488_s18 = smov %s1178_s19 }
 0x2a9   : > { %p19_p11 = scmp.ge.s32.totalorder %s22_s23, 4   ;;  %s1489_s19 = smov %s1182_s20 }
 0x2aa   : > { %s1490_s20 = smov %s1344_s14  ;;  %s1491_s21 = smov %s1190_s22 }
 0x2ab   : > { %s1492_s22 = smov %s1494_s25  ;;  %21 = sbr.rel (!%p19_p11) target bundleno = 9 (0x9), region = 97 }
 0x2b0   :  { %718 = vsyncpa [#allocation3], 1 }
 0x2b1   :  { %720 = vsyncpa [#allocation3 + $0x1], 1 }
 0x2b2   :  { %721 = vsyncpa [#allocation6], 1 }
 0x2b3   :  { %722 = vsyncpa [#allocation4], 1 }
 0x2b4   :  { %724 = vsyncpa [#allocation4 + $0x1], 1 }

</bundles_post_ra>
